<compile_context>
chip_gen: v7x
topology: tpu7x:2x2x1
jax: 0.10.0
libtpu: 0.0.40
codegen_flags: <defaults>
</compile_context>

<pallas_src>
import jax
import jax.numpy as jnp
import numpy as np
from jax.experimental import pallas as pl
from jax.experimental.pallas import tpu as pltpu


def _round_up(v, m):
    return ((v + m - 1) // m) * m


def _vmem_capacity_bytes():
    try:
        return int(pltpu.get_tpu_info().vmem_capacity_bytes)
    except Exception:
        return 128 * 1024 * 1024  # conservative fallback (v5e/v6e)


def _largest_dividing_chunk(total, target):
    """Largest multiple of 128 that divides `total` and is <= max(target, 128)."""
    t = min((max(target, 128) // 128) * 128, total)
    while total % t != 0:
        t -= 128
    return t


# -------------------------- kernel bodies ---------------------------------

def ffn_kernel_f32out(x_ref, w1_ref, b1_ref, w2_ref, b2_ref, o_ref):
    """Accumulates directly into the (f32, VMEM-resident) output tile."""
    k = pl.program_id(1)

    @pl.when(k == 0)
    def _init():
        # Fold the second bias into the accumulator init.
        o_ref[...] = jnp.broadcast_to(b2_ref[...], o_ref.shape)

    # Cast the f32 activation tile to the MXU dtype in-kernel (no HBM copy).
    xb = x_ref[...].astype(w1_ref.dtype)
    h = jnp.dot(xb, w1_ref[...], preferred_element_type=jnp.float32)
    h = jnp.maximum(h + b1_ref[...], 0.0)          # bias + ReLU on the VPU
    # Dropout: eval-mode identity (matches module.eval()).
    o_ref[...] += jnp.dot(h.astype(w2_ref.dtype), w2_ref[...],
                          preferred_element_type=jnp.float32)


def ffn_kernel_acc(x_ref, w1_ref, b1_ref, w2_ref, b2_ref, o_ref, acc_ref):
    """Variant with an f32 scratch accumulator for non-f32 output dtypes."""
    k = pl.program_id(1)

    @pl.when(k == 0)
    def _init():
        acc_ref[...] = jnp.broadcast_to(b2_ref[...], acc_ref.shape)

    xb = x_ref[...].astype(w1_ref.dtype)
    h = jnp.dot(xb, w1_ref[...], preferred_element_type=jnp.float32)
    h = jnp.maximum(h + b1_ref[...], 0.0)
    acc_ref[...] += jnp.dot(h.astype(w2_ref.dtype), w2_ref[...],
                            preferred_element_type=jnp.float32)

    @pl.when(k == pl.num_programs(1) - 1)
    def _finalize():
        o_ref[...] = acc_ref[...].astype(o_ref.dtype)


# ---------------------------- wrapper --------------------------------------

def prepare_ffn_params(w1, b1, w2, b2, *, compute_dtype=jnp.bfloat16):
    """Pad weights to lane-aligned shapes and cast to the MXU dtype ONCE.

    Hoist this out of the hot path and reuse the result across calls; the
    per-call wrapper no longer touches the full weight matrices. Padding is
    skipped when E/H are already 128-aligned and the dtype already matches.
    """
    E, H = w1.shape
    Ep, Hp = _round_up(E, 128), _round_up(H, 128)

    if (Ep, Hp) == (E, H) and w1.dtype == compute_dtype:
        w1p = w1
    else:
        w1p = jnp.zeros((Ep, Hp), compute_dtype).at[:E, :H].set(
            w1.astype(compute_dtype))
    if (Hp, Ep) == (H, E) and w2.dtype == compute_dtype:
        w2p = w2
    else:
        w2p = jnp.zeros((Hp, Ep), compute_dtype).at[:H, :E].set(
            w2.astype(compute_dtype))

    if Hp == H:
        b1p = b1.astype(jnp.float32).reshape(1, H)
    else:
        b1p = jnp.zeros((1, Hp), jnp.float32).at[0, :H].set(b1.astype(jnp.float32))
    if Ep == E:
        b2p = b2.astype(jnp.float32).reshape(1, E)
    else:
        b2p = jnp.zeros((1, Ep), jnp.float32).at[0, :E].set(b2.astype(jnp.float32))

    return (w1p, b1p, w2p, b2p, E, H)


def feed_forward_prepared(x, params, *, tm=None, th=None):
    """Fused Linear -> ReLU -> Dropout(eval) -> Linear with prepared weights."""
    w1p, b1p, w2p, b2p, E, H = params
    B, S, E_in = x.shape
    assert E_in == E, "embed size mismatch with prepared params"
    Ep, Hp = w1p.shape
    N = B * S
    out_dtype = x.dtype
    use_scratch = np.dtype(out_dtype) != np.dtype(jnp.float32)

    x_it = np.dtype(x.dtype).itemsize
    c_it = np.dtype(w1p.dtype).itemsize
    o_it = np.dtype(out_dtype).itemsize

    # -------- generation-aware tile / VMEM budgeting --------
    vmem_cap = _vmem_capacity_bytes()
    small_vmem = vmem_cap <= 64 * 1024 * 1024          # v7x: 64 MiB / TensorCore
    if tm is None:
        tm = 512                                        # intensity = tm FLOPs/byte
    if th is None:
        th = 256 if small_vmem else 512                 # th does not affect intensity
    if small_vmem:
        budget = min(int(vmem_cap * 0.75), 52 * 1024 * 1024)   # leave headroom on v7x
    else:
        budget = min(int(vmem_cap * 0.80), 100 * 1024 * 1024)  # v5e/v6e: 128 MiB phys

    # Row tile: sublane-aligned, clamped to N; keep >=2 row tiles (megacore) when
    # N is large enough to split usefully.
    tm_eff = min(tm, _round_up(N, 8))
    if _round_up(N, tm_eff) // tm_eff < 2 and tm_eff >= 256:
        tm_eff = _round_up(tm_eff // 2, 8)

    # Hidden chunk: largest 128-multiple divisor of Hp (no over-padding of H).
    th_eff = _largest_dividing_chunk(Hp, th)

    def _est(tm_e, th_e):
        return (2 * (tm_e * Ep * x_it       # x tile (double-buffered alloc)
                     + Ep * th_e * c_it     # W1 chunk
                     + th_e * 4             # b1 chunk
                     + th_e * Ep * c_it     # W2 chunk
                     + Ep * 4               # b2
                     + tm_e * Ep * o_it)    # out tile
                + (tm_e * Ep * 4 if use_scratch else 0))

    # Auto-shrink to stay inside the per-generation VMEM budget: th first
    # (doesn't change arithmetic intensity), then tm.
    while _est(tm_eff, th_eff) > budget and th_eff > 128:
        th_eff = _largest_dividing_chunk(Hp, th_eff - 128)
    while _est(tm_eff, th_eff) > budget and tm_eff > 128:
        tm_eff = _round_up(tm_eff // 2, 8)

    Np = _round_up(N, tm_eff)

    # Pad activations only if needed (rows to tm multiple, E to lane multiple);
    # x keeps its input dtype — the bf16 cast happens inside the kernel.
    x2 = x.reshape(N, E)
    if Np != N or Ep != E:
        x2 = jnp.zeros((Np, Ep), x.dtype).at[:N, :E].set(x2)

    grid = (Np // tm_eff, Hp // th_eff)
    n_row_tiles = grid[0]

    cost = pl.CostEstimate(
        flops=4 * Np * Ep * Hp,                      # two GEMMs
        transcendentals=0,
        bytes_accessed=int(Np * Ep * x_it            # activations read once
                           + n_row_tiles * (2 * Ep * Hp * c_it + Hp * 4 + Ep * 4)
                           + Np * Ep * o_it),        # weights re-streamed per row tile
    )

    kernel = ffn_kernel_acc if use_scratch else ffn_kernel_f32out
    scratch = ([pltpu.VMEM((tm_eff, Ep), jnp.float32)] if use_scratch else [])

    out2 = pl.pallas_call(
        kernel,
        out_shape=jax.ShapeDtypeStruct((Np, Ep), out_dtype),
        grid_spec=pltpu.PrefetchScalarGridSpec(
            num_scalar_prefetch=0,
            grid=grid,
            in_specs=[
                pl.BlockSpec((tm_eff, Ep), lambda i, k: (i, 0)),   # x row tile
                pl.BlockSpec((Ep, th_eff), lambda i, k: (0, k)),   # W1 hidden chunk
                pl.BlockSpec((1, th_eff), lambda i, k: (0, k)),    # b1 chunk
                pl.BlockSpec((th_eff, Ep), lambda i, k: (k, 0)),   # W2 hidden chunk
                pl.BlockSpec((1, Ep), lambda i, k: (0, 0)),        # b2
            ],
            out_specs=pl.BlockSpec((tm_eff, Ep), lambda i, k: (i, 0)),
            scratch_shapes=scratch,
        ),
        compiler_params=pltpu.CompilerParams(
            dimension_semantics=("parallel", "arbitrary"),
            vmem_limit_bytes=int(budget),
        ),
        cost_estimate=cost,
    )(x2, w1p, b1p, w2p, b2p)

    out = out2 if (Np == N and Ep == E) else out2[:N, :E]
    return out.reshape(B, S, E)


def feed_forward(x, w1, b1, w2, b2, *, tm=None, th=None,
                 compute_dtype=jnp.bfloat16):
    """Convenience wrapper: prepares weights then runs the fused kernel.

    For repeated calls, call prepare_ffn_params() once and reuse it with
    feed_forward_prepared() to avoid re-padding/re-casting the weights.
    """
    params = prepare_ffn_params(w1, b1, w2, b2, compute_dtype=compute_dtype)
    return feed_forward_prepared(x, params, tm=tm, th=th)


def reference_feed_forward(x, w1, b1, w2, b2):
    h = jnp.maximum(jnp.einsum("bse,eh->bsh", x, w1) + b1, 0.0)
    return jnp.einsum("bsh,he->bse", h, w2) + b2


if __name__ == "__main__":
    # Small shapes consistent with the module's forward: (batch, seq, embed).
    B, S, E, H = 2, 8, 32, 64
    key = jax.random.PRNGKey(0)
    kx, kw1, kb1, kw2, kb2 = jax.random.split(key, 5)

    x = jax.random.normal(kx, (B, S, E), dtype=jnp.float32)
    # nn.Linear(embed, hidden) / nn.Linear(hidden, embed) weights, stored
    # transposed for x @ W.
    w1 = jax.random.normal(kw1, (E, H), dtype=jnp.float32) * 0.05
    b1 = jax.random.normal(kb1, (H,), dtype=jnp.float32) * 0.05
    w2 = jax.random.normal(kw2, (H, E), dtype=jnp.float32) * 0.05
    b2 = jax.random.normal(kb2, (E,), dtype=jnp.float32) * 0.05

    # Prepare weights once (hoisted out of the hot path), then run the kernel.
    params = prepare_ffn_params(w1, b1, w2, b2)
    out = feed_forward_prepared(x, params)
    out = jax.block_until_ready(out)

    ref = reference_feed_forward(x, w1, b1, w2, b2)
    assert out.shape == (B, S, E)
    # bf16 matmul inputs with f32 accumulation -> loosened tolerance vs f32 ref.
    assert jnp.allclose(out, ref, atol=2e-2, rtol=2e-2), "mismatch vs reference"

    print("KERNEL_OK")
</pallas_src>

<mosaic_0001>
module attributes {stable_mosaic.version = 11 : i64} {
  func.func @ffn_kernel_f32out(%arg0: i32, %arg1: i32, %arg2: memref<16x128xf32, #tpu.memory_space<vmem>>, %arg3: memref<128x128xbf16, #tpu.memory_space<vmem>>, %arg4: memref<1x128xf32, #tpu.memory_space<vmem>>, %arg5: memref<128x128xbf16, #tpu.memory_space<vmem>>, %arg6: memref<1x128xf32, #tpu.memory_space<vmem>>, %arg7: memref<16x128xf32, #tpu.memory_space<vmem>>) attributes {dimension_semantics = [#tpu.dimension_semantics<parallel>, #tpu.dimension_semantics<arbitrary>], iteration_bounds = array<i64: 1, 1>, scalar_prefetch = 0 : i64, scratch_operands = 0 : i64, tpu.core_type = #tpu.core_type<tc>, window_params = [{transform_indices = @transform_0, window_bounds = array<i64: 16, 128>}, {transform_indices = @transform_1, window_bounds = array<i64: 128, 128>}, {transform_indices = @transform_2, window_bounds = array<i64: 1, 128>}, {transform_indices = @transform_3, window_bounds = array<i64: 128, 128>}, {pipeline_mode = #tpu.pipeline_mode<synchronous>, transform_indices = @transform_4, window_bounds = array<i64: 1, 128>}, {transform_indices = @transform_5, window_bounds = array<i64: 16, 128>}]} {
    %c0_i32 = arith.constant 0 : i32
    %0 = arith.cmpi eq, %arg1, %c0_i32 : i32
    %1 = arith.extui %0 : i1 to i32
    %c0_i32_0 = arith.constant 0 : i32
    %2 = arith.cmpi ne, %1, %c0_i32_0 : i32
    scf.if %2 {
      %c0_14 = arith.constant 0 : index
      %c0_15 = arith.constant 0 : index
      %18 = vector.load %arg6[%c0_14, %c0_15] : memref<1x128xf32, #tpu.memory_space<vmem>>, vector<1x128xf32>
      %19 = vector.shape_cast %18 : vector<1x128xf32> to vector<1x128xf32>
      %20 = vector.broadcast %19 : vector<1x128xf32> to vector<16x128xf32>
      %c0_16 = arith.constant 0 : index
      %c0_17 = arith.constant 0 : index
      %21 = vector.load %arg7[%c0_16, %c0_17] : memref<16x128xf32, #tpu.memory_space<vmem>>, vector<16x128xf32>
      tpu.vector_store %arg7[%c0_16, %c0_17], %20 {strides = array<i32>} : memref<16x128xf32, #tpu.memory_space<vmem>>, vector<16x128xf32>,
    } else {
    }
    %c0 = arith.constant 0 : index
    %c0_1 = arith.constant 0 : index
    %3 = vector.load %arg2[%c0, %c0_1] : memref<16x128xf32, #tpu.memory_space<vmem>>, vector<16x128xf32>
    %4 = arith.truncf %3 : vector<16x128xf32> to vector<16x128xbf16>
    %c0_2 = arith.constant 0 : index
    %c0_3 = arith.constant 0 : index
    %5 = vector.load %arg3[%c0_2, %c0_3] : memref<128x128xbf16, #tpu.memory_space<vmem>>, vector<128x128xbf16>
    %cst = arith.constant dense<0.000000e+00> : vector<16x128xf32>
    %6 = tpu.matmul %4, %5, %cst {dimension_numbers = #tpu.dot_dimension_numbers<[1], [0], [0], [1], [0, 0, 1, 1], [], []>} : vector<16x128xbf16>, vector<128x128xbf16>, vector<16x128xf32> -> vector<16x128xf32>
    %c0_4 = arith.constant 0 : index
    %c0_5 = arith.constant 0 : index
    %7 = vector.load %arg4[%c0_4, %c0_5] : memref<1x128xf32, #tpu.memory_space<vmem>>, vector<1x128xf32>
    %8 = vector.broadcast %7 : vector<1x128xf32> to vector<16x128xf32>
    %9 = arith.addf %6, %8 : vector<16x128xf32>
    %cst_6 = arith.constant 0.000000e+00 : f32
    %10 = vector.broadcast %cst_6 : f32 to vector<16x128xf32>
    %11 = arith.maximumf %9, %10 : vector<16x128xf32>
    %c0_7 = arith.constant 0 : index
    %c0_8 = arith.constant 0 : index
    %12 = vector.load %arg7[%c0_7, %c0_8] : memref<16x128xf32, #tpu.memory_space<vmem>>, vector<16x128xf32>
    %13 = arith.truncf %11 : vector<16x128xf32> to vector<16x128xbf16>
    %c0_9 = arith.constant 0 : index
    %c0_10 = arith.constant 0 : index
    %14 = vector.load %arg5[%c0_9, %c0_10] : memref<128x128xbf16, #tpu.memory_space<vmem>>, vector<128x128xbf16>
    %cst_11 = arith.constant dense<0.000000e+00> : vector<16x128xf32>
    %15 = tpu.matmul %13, %14, %cst_11 {dimension_numbers = #tpu.dot_dimension_numbers<[1], [0], [0], [1], [0, 0, 1, 1], [], []>} : vector<16x128xbf16>, vector<128x128xbf16>, vector<16x128xf32> -> vector<16x128xf32>
    %16 = arith.addf %12, %15 : vector<16x128xf32>
    %c0_12 = arith.constant 0 : index
    %c0_13 = arith.constant 0 : index
    %17 = vector.load %arg7[%c0_12, %c0_13] : memref<16x128xf32, #tpu.memory_space<vmem>>, vector<16x128xf32>
    tpu.vector_store %arg7[%c0_12, %c0_13], %16 {strides = array<i32>} : memref<16x128xf32, #tpu.memory_space<vmem>>, vector<16x128xf32>,
    return
  }
  func.func @transform_0(%arg0: i32, %arg1: i32) -> (i32, i32) {
    %c0_i32 = arith.constant 0 : i32
    %c0_i32_0 = arith.constant 0 : i32
    return %arg0, %c0_i32 : i32, i32
  }
  func.func @transform_1(%arg0: i32, %arg1: i32) -> (i32, i32) {
    %c0_i32 = arith.constant 0 : i32
    %c0_i32_0 = arith.constant 0 : i32
    return %c0_i32, %arg1 : i32, i32
  }
  func.func @transform_2(%arg0: i32, %arg1: i32) -> (i32, i32) {
    %c0_i32 = arith.constant 0 : i32
    %c0_i32_0 = arith.constant 0 : i32
    return %c0_i32, %arg1 : i32, i32
  }
  func.func @transform_3(%arg0: i32, %arg1: i32) -> (i32, i32) {
    %c0_i32 = arith.constant 0 : i32
    %c0_i32_0 = arith.constant 0 : i32
    return %arg1, %c0_i32 : i32, i32
  }
  func.func @transform_4(%arg0: i32, %arg1: i32) -> (i32, i32) {
    %c0_i32 = arith.constant 0 : i32
    %c0_i32_0 = arith.constant 0 : i32
    %c0_i32_1 = arith.constant 0 : i32
    return %c0_i32, %c0_i32_0 : i32, i32
  }
  func.func @transform_5(%arg0: i32, %arg1: i32) -> (i32, i32) {
    %c0_i32 = arith.constant 0 : i32
    %c0_i32_0 = arith.constant 0 : i32
    return %arg0, %c0_i32 : i32, i32
  }
}

</mosaic_0001>

<bundles_post_ra>
// kernel: tpu_custom_call.1
= control target key start
LH: loop header
LB: loop body
LE: loop exit
PB: predicated region body
PF: predicated region fallthrough
CT: control target
= control target key end

     0   :  { %10 = vsyncpa [#allocation3], 0  ;;  %s711_s0 = inlined_call_operand.hbm [shape: f32[16,128], index: 0, kind: input, shape index: {}]   ;;  %s712_s1 = inlined_call_operand.hbm [shape: bf16[128,128], index: 1, kind: input, shape index: {}]   ;;  %s713_s2 = inlined_call_operand.hbm [shape: f32[1,128], index: 2, kind: input, shape index: {}]   ;;  %s714_s3 = inlined_call_operand.hbm [shape: bf16[128,128], index: 3, kind: input, shape index: {}]   ;;  %s715_s4 = inlined_call_operand.hbm [shape: f32[1,128], index: 4, kind: input, shape index: {}]   ;;  %s716_s5 = inlined_call_operand.hbm [shape: f32[16,128], index: 5, kind: output, shape index: {}]  }
   0x1   :  { %11 = vsyncpa [#allocation6], 0 }
   0x2   :  { %12 = vsyncpa [#allocation9], 0 }
   0x3   :  { %13 = vsyncpa [#allocation4], 0  ;;  %s591_s18 = smov [#allocation5]   ;;  %s451_s22 = scalar_lea.hbm %s712_s1, 1024 }
   0x4   :  { %s31_s19 = sshll.u32 %s591_s18, 4  ;;  %p452_p0 = scmp.ne.s32.totalorder %s712_s1, %s451_s22  ;;  %s32_s19 = int_to_ptr.vmem [resolvable:$true] %s31_s19 }
   0x5   :  { %p455_p1 = scmp.lt.u32.totalorder %s451_s22, %s712_s1 }
   0x7   :  { %p457_p2 = pnand %p455_p1, %p452_p0 }
   0x9   :  { %460 = shalt.err (!%p457_p2)
}
   0xa   :  { %s461_s27 = scalar_lea.vmem %s32_s19, 1024  ;;  %p466_p4 = scmp.lt.s32.totalorder %s32_s19, %s32_s19 }
   0xb   :  { %p462_p3 = scmp.ne.s32.totalorder %s32_s19, %s461_s27  ;;  %p467_p5 = scmp.lt.s32.totalorder %s461_s27, %s461_s27 }
   0xd   :  { %p468_p6 = por %p467_p5, %p466_p4 }
   0xf   :  { %p469_p7 = pnand %p468_p6, %p462_p3 }
  0x11   :  { %472 = shalt.err (!%p469_p7)
}
  0x12   :  { %s592_s28 = smov 64   ;;  %s593_s29 = smov 4  }
  0x13   :  { %37 = dma.hbm_to_vmem [thread:$0]  %s712_s1, 1024, %s32_s19, [#allocation6], %s592_s28, %s592_s28, %s593_s29  }
  0x14   :  { %s594_s7 = smov [#allocation8]   ;;  %s595_s9 = smov [#allocation2]  }
  0x15   :  { %s53_s8 = sshll.u32 %s594_s7, 4  ;;  %s19_s10 = sshll.u32 %s595_s9, 4  ;;  %s54_s8 = int_to_ptr.vmem [resolvable:$true] %s53_s8  ;;  %s20_s10 = int_to_ptr.vmem [resolvable:$true] %s19_s10 }
  0x16   :  { %s473_s13 = scalar_lea.hbm %s714_s3, 1024 }
  0x17   :  { %p474_p8 = scmp.ne.s32.totalorder %s714_s3, %s473_s13  ;;  %p477_p9 = scmp.lt.u32.totalorder %s473_s13, %s714_s3 }
  0x19   :  { %p479_p10 = pnand %p477_p9, %p474_p8 }
  0x1b   :  { %482 = shalt.err (!%p479_p10)
}
  0x1c   :  { %s483_s1 = scalar_lea.vmem %s54_s8, 1024  ;;  %p488_p12 = scmp.lt.s32.totalorder %s54_s8, %s54_s8 }
  0x1d   :  { %p484_p11 = scmp.ne.s32.totalorder %s54_s8, %s483_s1  ;;  %p489_p13 = scmp.lt.s32.totalorder %s483_s1, %s483_s1 }
  0x1f   :  { %p490_p0 = por %p489_p13, %p488_p12 }
  0x21   :  { %p491_p1 = pnand %p490_p0, %p484_p11 }
  0x23   :  { %494 = shalt.err (!%p491_p1)
}
  0x24   :  { %59 = dma.hbm_to_vmem [thread:$0]  %s714_s3, 1024, %s54_s8, [#allocation9], %s592_s28, %s592_s28, %s593_s29  }
  0x25   :  { %s495_s22 = scalar_lea.hbm %s711_s0, 256 }
  0x26   :  { %p496_p2 = scmp.ne.s32.totalorder %s711_s0, %s495_s22  ;;  %p499_p3 = scmp.lt.u32.totalorder %s495_s22, %s711_s0 }
  0x28   :  { %p501_p4 = pnand %p499_p3, %p496_p2 }
  0x2a   :  { %504 = shalt.err (!%p501_p4)
}
  0x2b   :  { %s505_s27 = scalar_lea.vmem %s20_s10, 256  ;;  %p510_p6 = scmp.lt.s32.totalorder %s20_s10, %s20_s10 }
  0x2c   :  { %p506_p5 = scmp.ne.s32.totalorder %s20_s10, %s505_s27  ;;  %p511_p7 = scmp.lt.s32.totalorder %s505_s27, %s505_s27 }
  0x2e   :  { %p512_p8 = por %p511_p7, %p510_p6 }
  0x30   :  { %p513_p9 = pnand %p512_p8, %p506_p5 }
  0x32   :  { %516 = shalt.err (!%p513_p9)
}
  0x33   :  { %s596_s3 = smov 128   ;;  %s597_s28 = smov 8  }
  0x34   :  { %25 = dma.hbm_to_vmem [thread:$0]  %s711_s0, 256, %s20_s10, [#allocation3], %s596_s3, %s596_s3, %s597_s28  }
  0x35   :  { %s598_s6 = smov [#allocation7]   ;;  %s599_s8 = smov [#allocation10]  }
  0x36   :  { %s44_s7 = sshll.u32 %s598_s6, 4  ;;  %s66_s9 = sshll.u32 %s599_s8, 4  ;;  %s45_s7 = int_to_ptr.vmem [resolvable:$true] %s44_s7  ;;  %s67_s9 = int_to_ptr.vmem [resolvable:$true] %s66_s9 }
  0x37   :  { %s517_s13 = scalar_lea.hbm %s713_s2, 16 }
  0x38   :  { %p518_p10 = scmp.ne.s32.totalorder %s713_s2, %s517_s13  ;;  %p521_p11 = scmp.lt.u32.totalorder %s517_s13, %s713_s2 }
  0x3a   :  { %p523_p12 = pnand %p521_p11, %p518_p10 }
  0x3c   :  { %526 = shalt.err (!%p523_p12)
}
  0x3d   :  { %s527_s0 = scalar_lea.vmem %s45_s7, 16  ;;  %s531_s10 = scalar_lea.vmem %s45_s7, 32 }
  0x3e   :  { %p528_p13 = scmp.ne.s32.totalorder %s45_s7, %s527_s0  ;;  %p532_p0 = scmp.lt.s32.totalorder %s45_s7, %s45_s7 }
  0x3f   :  { %p533_p1 = scmp.lt.s32.totalorder %s531_s10, %s527_s0 }
  0x41   :  { %p534_p2 = por %p533_p1, %p532_p0 }
  0x43   :  { %p535_p3 = pnand %p534_p2, %p528_p13 }
  0x45   :  { %538 = shalt.err (!%p535_p3)
}
  0x46   :  { %47 = dma.hbm_to_vmem [thread:$0]  %s713_s2, 16, %s45_s7, [#allocation6]  }
  0x47   :  { %s539_s21 = scalar_lea.hbm %s715_s4, 16 }
  0x48   :  { %p540_p4 = scmp.ne.s32.totalorder %s715_s4, %s539_s21  ;;  %p543_p5 = scmp.lt.u32.totalorder %s539_s21, %s715_s4 }
  0x4a   :  { %p545_p6 = pnand %p543_p5, %p540_p4 }
  0x4c   :  { %548 = shalt.err (!%p545_p6)
}
  0x4d   :  { %s549_s26 = scalar_lea.vmem %s67_s9, 16  ;;  %s553_s27 = scalar_lea.vmem %s67_s9, 32 }
  0x4e   :  { %p550_p7 = scmp.ne.s32.totalorder %s67_s9, %s549_s26  ;;  %p554_p8 = scmp.lt.s32.totalorder %s67_s9, %s67_s9 }
  0x4f   :  { %p555_p9 = scmp.lt.s32.totalorder %s553_s27, %s549_s26 }
  0x51   :  { %p556_p10 = por %p555_p9, %p554_p8 }
  0x53   :  { %p557_p11 = pnand %p556_p10, %p550_p7 }
  0x55   :  { %560 = shalt.err (!%p557_p11)
}
  0x56   :  { %69 = dma.hbm_to_vmem [thread:$0]  %s715_s4, 16, %s67_s9, [#allocation9]  }
  0x57   :  { %583 = dma.done.wait [#allocation3], 256  }
  0x58   :  { %584 = vsyncadd [#allocation3], 4294967040 }
  0x59   :  { %585 = dma.done.wait [#allocation6], 1040  }
  0x5a   :  { %586 = vsyncadd [#allocation6], 4294966256 }
  0x5b   :  { %587 = dma.done.wait [#allocation9], 1040  }
  0x5c   :  { %588 = vsyncadd [#allocation9], 4294966256  ;;  %v600_v0 = vmov 0.0   ;;  %vm601_vm0 = vmmov 0   ;;  %v435_v1 = vld [vmem:[#allocation5] sm:$0xff]   ;;  %v436_v2 = vld [vmem:[#allocation5 + $0x8] sm:$0xff]  }
  0x5d   :  { %383 = vmatprep.subr.bf16.mxu0 %v600_v0  ;;  %399 = vmatprep.mubr.msk.bf16.mxu0 %vm601_vm0, %v600_v0  ;;  %v437_v3 = vld [vmem:[#allocation5 + $0x10] sm:$0xff]   ;;  %v443_v4 = vld [vmem:[#allocation8] sm:$0xff]   ;;  %v438_v5 = vld [vmem:[#allocation5 + $0x18] sm:$0xff]   ;;  %s602_s4 = smov [#allocation11]  }
  0x5e   :  { %403 = vmatprep.subr.bf16.mxu1 %v600_v0  ;;  %419 = vmatprep.mubr.msk.bf16.mxu1 %vm601_vm0, %v600_v0  ;;  %v444_v6 = vld [vmem:[#allocation8 + $0x8] sm:$0xff]   ;;  %v439_v7 = vld [vmem:[#allocation5 + $0x20] sm:$0xff]   ;;  %v445_v8 = vld [vmem:[#allocation8 + $0x10] sm:$0xff]   ;;  %s333_s30 = sshll.u32 %s602_s4, 4  ;;  %s334_s30 = int_to_ptr.vmem [resolvable:$true] %s333_s30 }
  0x5f   :  { %384 = vmatpush3.bf16.msra.mxu0 %v435_v1  ;;  %404 = vmatpush3.bf16.msra.mxu1 %v443_v4  ;;  %v440_v9 = vld [vmem:[#allocation5 + $0x28] sm:$0xff]   ;;  %v446_v10 = vld [vmem:[#allocation8 + $0x18] sm:$0xff]   ;;  %v441_v11 = vld [vmem:[#allocation5 + $0x30] sm:$0xff]   ;;  %s561_s6 = scalar_lea.vmem %s334_s30, 256  ;;  %p566_p13 = scmp.lt.s32.totalorder %s334_s30, %s334_s30 }
  0x60   :  { %385 = vmatprep.subr.bf16.mxu0 %v600_v0  ;;  %405 = vmatprep.subr.bf16.mxu1 %v600_v0  ;;  %v447_v12 = vld [vmem:[#allocation8 + $0x20] sm:$0xff]   ;;  %v442_v13 = vld [vmem:[#allocation5 + $0x38] sm:$0xff]   ;;  %v99_v14 = vld [vmem:[#allocation2] sm:$0xff]  ;;  %p562_p12 = scmp.ne.s32.totalorder %s334_s30, %s561_s6  ;;  %p567_p0 = scmp.lt.s32.totalorder %s561_s6, %s561_s6 }
  0x61   :  { %v100_v15 = vld [vmem:[#allocation2 + $0x8] sm:$0xff]  ;;  %v448_v16 = vld [vmem:[#allocation8 + $0x28] sm:$0xff]   ;;  %v348_v20 = vld [vmem:[#allocation7] ss:$0 sm:$0xff] }
  0x62   :  { %v101_v17 = vpack.c.bf16 %v100_v15, %v99_v14  ;;  %v449_v18 = vld [vmem:[#allocation8 + $0x30] sm:$0xff]   ;;  %v450_v19 = vld [vmem:[#allocation8 + $0x38] sm:$0xff]   ;;  %v347_v30 = vld [vmem:[#allocation10] ss:$0 sm:$0xff]  ;;  %p568_p1 = por %p567_p0, %p566_p13 }
  0x63   :  { %386 = vmatpush3.bf16.msra.mxu0 %v436_v2  ;;  %406 = vmatpush3.bf16.msra.mxu1 %v444_v6 }
  0x64   :  { %387 = vmatprep.subr.bf16.mxu0 %v600_v0  ;;  %407 = vmatprep.subr.bf16.mxu1 %v600_v0  ;;  %p569_p2 = pnand %p568_p1, %p562_p12 }
  0x67   :  { %388 = vmatpush3.bf16.msra.mxu0 %v437_v3  ;;  %408 = vmatpush3.bf16.msra.mxu1 %v445_v8 }
  0x68   :  { %389 = vmatprep.subr.bf16.mxu0 %v600_v0  ;;  %409 = vmatprep.subr.bf16.mxu1 %v600_v0 }
  0x6b   :  { %390 = vmatpush3.bf16.msra.mxu0 %v438_v5  ;;  %410 = vmatpush3.bf16.msra.mxu1 %v446_v10 }
  0x6c   :  { %391 = vmatprep.subr.bf16.mxu0 %v600_v0  ;;  %411 = vmatprep.subr.bf16.mxu1 %v600_v0 }
  0x6f   :  { %392 = vmatpush3.bf16.msra.mxu0 %v439_v7  ;;  %412 = vmatpush3.bf16.msra.mxu1 %v447_v12 }
  0x70   :  { %393 = vmatprep.subr.bf16.mxu0 %v600_v0  ;;  %413 = vmatprep.subr.bf16.mxu1 %v600_v0 }
  0x73   :  { %394 = vmatpush3.bf16.msra.mxu0 %v440_v9  ;;  %414 = vmatpush3.bf16.msra.mxu1 %v448_v16 }
  0x74   :  { %395 = vmatprep.subr.bf16.mxu0 %v600_v0  ;;  %415 = vmatprep.subr.bf16.mxu1 %v600_v0 }
  0x77   :  { %396 = vmatpush3.bf16.msra.mxu0 %v441_v11  ;;  %416 = vmatpush3.bf16.msra.mxu1 %v449_v18 }
  0x78   :  { %397 = vmatprep.subr.bf16.mxu0 %v600_v0  ;;  %417 = vmatprep.subr.bf16.mxu1 %v600_v0 }
  0x7b   :  { %398 = vmatpush3.bf16.msra.mxu0 %v442_v13  ;;  %418 = vmatpush3.bf16.msra.mxu1 %v450_v19 }
  0x7e   :  { %400 = vmatmul.mubr.bf16.vlgmr.msra.gmra.mrb[0].mxu0 %v101_v17 }
 0x151   :  { %v207_v21 = vpop.f32.mrb[0].mxu0 }
 0x152   :  { %v208_v22 = vadd.f32 %v348_v20, %v207_v21  ;;  %v401_v23 = vpop.f32.mrb[1].mxu0 }
 0x153   :  { %v210_v24 = vpop.f32.mrb[2].mxu0 }
 0x154   :  { %v211_v25 = vadd.f32 %v348_v20, %v210_v24  ;;  %v402_v26 = vpop.f32.mrb[3].mxu0  ;;  %v214_v27 = vmax.f32 %v208_v22, 0.0 }
 0x156   :  { %v215_v28 = vmax.f32 %v211_v25, 0.0 }
 0x158   :  { %v218_v29 = vpack.c.bf16 %v215_v28, %v214_v27 }
 0x15a   :  { %420 = vmatmul.mubr.bf16.vlgmr.msra.gmra.mrb[0].mxu1 %v218_v29 }
 0x22d   :  { %v317_v31 = vpop.f32.mrb[0].mxu1 }
 0x22e   :  { %v324_v32 = vadd.f32 %v347_v30, %v317_v31  ;;  %v421_v33 = vpop.f32.mrb[1].mxu1 }
 0x22f   :  { %v320_v34 = vpop.f32.mrb[2].mxu1 }
 0x230   :  { %326 = vst [vmem:[#allocation11] sm:$0xff] %v324_v32  ;;  %v325_v35 = vadd.f32 %v347_v30, %v320_v34  ;;  %v422_v36 = vpop.f32.mrb[3].mxu1 }
 0x232   :  { %327 = vst [vmem:[#allocation11 + $0x8] sm:$0xff] %v325_v35 }
 0x233   :  { %572 = shalt.err (!%p569_p2)
}
 0x234   :  { %s573_s9 = scalar_lea.hbm %s716_s5, 256 }
 0x235   :  { %p574_p3 = scmp.ne.s32.totalorder %s716_s5, %s573_s9  ;;  %p577_p4 = scmp.lt.u32.totalorder %s573_s9, %s716_s5 }
 0x237   :  { %p579_p5 = pnand %p577_p4, %p574_p3 }
 0x239   :  { %582 = shalt.err (!%p579_p5)
}
 0x23a   :  { %339 = dma.vmem_to_hbm [thread:$0]  %s334_s30, 256, %s716_s5, [#allocation4], %s596_s3, %s596_s3, %s597_s28  }
 0x23b   :  { %589 = dma.done.wait [#allocation4], 256  }
 0x23c   :  { %590 = vsyncadd [#allocation4], 4294967040 }
 0x23d   :  { %343 = vsyncpa [#allocation3], 1 }
 0x23e   :  { %344 = vsyncpa [#allocation6], 1 }
 0x23f   :  { %345 = vsyncpa [#allocation9], 1 }
 0x240   :  { %346 = vsyncpa [#allocation4], 1 }

</bundles_post_ra>
